<compile_context>
chip_gen: v5e
topology: v5e:2x2
jax: 0.10.0
libtpu: 0.0.40
codegen_flags: <defaults>
</compile_context>

<pallas_src>
import math

import jax
import jax.numpy as jnp
from jax.experimental import pallas as pl
from jax.experimental.pallas import tpu as pltpu


def _round_up(v, m):
    return ((v + m - 1) // m) * m


def _row_tile(total, cap):
    """Largest multiple-of-8 divisor of `total` (itself a multiple of 8) <= cap."""
    t = min(total, max(8, (cap // 8) * 8))
    while total % t:
        t -= 8
    return t


def _lane_tile(total, cap):
    """Largest multiple-of-128 divisor of `total` (itself a multiple of 128) <= cap."""
    if total <= cap:
        return total
    t = max(128, (cap // 128) * 128)
    while total % t:
        t -= 128
    return t


def _vmem_limit(footprint_bytes):
    # Request roughly what we use (+ headroom); cap at 40 MiB so we stay well inside
    # v7x's 64 MiB physical VMEM (v5e/v6e have 128 MiB) with room for compiler scratch.
    return int(min(40 << 20, max(footprint_bytes + (4 << 20), 16 << 20)))


# ----------------------------------------------------------------------------
# Shared body: right-apply the Householder chain H_0 H_1 ... H_{n-1} to rows of q.
# ----------------------------------------------------------------------------
def _apply_reflection_chain(w_ref, q):
    """w_ref: (n_rows_pad, n_pad) f32 prescaled reflectors (zero rows = no-op,
    zero lanes keep padded columns untouched).  q: (rows, n_pad) f32 array."""
    n_rows = w_ref.shape[0]  # multiple of 8

    def group_body(g, q):
        base = pl.multiple_of(g * 8, 8)
        slab = w_ref[pl.ds(base, 8), :]                   # one aligned vld / 8 refl.
        for j in range(8):                                # static row extraction
            w = slab[j:j + 1, :]                          # (1, n_pad)
            s = jnp.sum(q * w, axis=-1, keepdims=True)    # (rows, 1)  -- XLU reduce
            q = q - s * w                                 # VPU
        return q

    return jax.lax.fori_loop(0, n_rows // 8, group_body, q)


# ----------------------------------------------------------------------------
# Kernel A (small batch): apply the chain directly to x, then add bias.
# ----------------------------------------------------------------------------
def apply_chain_kernel(w_ref, x_ref, b_ref, o_ref):
    x = x_ref[...].astype(jnp.float32)
    x = _apply_reflection_chain(w_ref, x)
    o_ref[...] = (x + b_ref[...]).astype(o_ref.dtype)


# ----------------------------------------------------------------------------
# Kernel B1 (large batch): build one row-block of Q by reflecting identity rows.
# Accumulates in f32; stores in the matmul dtype (bf16 by default).
# ----------------------------------------------------------------------------
def build_q_kernel(w_ref, q_ref):
    q_tile, n_pad = q_ref.shape
    r0 = pl.program_id(0) * q_tile
    rows = r0 + jax.lax.broadcasted_iota(jnp.int32, (q_tile, n_pad), 0)
    cols = jax.lax.broadcasted_iota(jnp.int32, (q_tile, n_pad), 1)
    q0 = jnp.where(rows == cols, 1.0, 0.0).astype(jnp.float32)
    q_ref[...] = _apply_reflection_chain(w_ref, q0).astype(q_ref.dtype)


# ----------------------------------------------------------------------------
# Kernel B2: out = x @ Q + bias.  Full-K variant (no accumulator, no K grid axis).
# ----------------------------------------------------------------------------
def matmul_bias_fullk_kernel(x_ref, q_ref, b_ref, o_ref):
    acc = jnp.dot(x_ref[...], q_ref[...], preferred_element_type=jnp.float32)
    o_ref[...] = (acc + b_ref[...]).astype(o_ref.dtype)


# Tiled-K fallback for very large n (f32 VMEM accumulator, K axis last/"arbitrary").
def matmul_bias_tiledk_kernel(x_ref, q_ref, b_ref, o_ref, acc_ref):
    k = pl.program_id(2)

    @pl.when(k == 0)
    def _():
        acc_ref[...] = jnp.zeros_like(acc_ref)

    acc_ref[...] += jnp.dot(x_ref[...], q_ref[...],
                            preferred_element_type=jnp.float32)

    @pl.when(k == pl.num_programs(2) - 1)
    def _():
        o_ref[...] = (acc_ref[...] + b_ref[...]).astype(o_ref.dtype)


# ----------------------------------------------------------------------------
# Wrapper
# ----------------------------------------------------------------------------
def orthogonal_linear(x, U, bias, *, max_batch_tile=512, matmul_dtype=jnp.bfloat16):
    """Forward pass of OrthogonalLinear: out = (x · H_0 · H_1 ··· H_{n-1}) + bias."""
    B, n = x.shape
    assert U.shape == (n, n) and bias.shape == (1, n)

    # ---- parameter reparametrization (glue, O(n^2)) --------------------------
    U_m = jnp.triu(U).astype(jnp.float32)              # Hprod only reads u[-k:] = triu row
    denom = jnp.sum(U_m * U_m, axis=1, keepdims=True)  # ||u_i||^2
    # NOTE: like the PyTorch module, this blows up if a triu row of U is ~zero.
    w = U_m * jnp.sqrt(2.0 / denom)                    # H_i = I - w_i w_i^T

    # ---- padding: lanes to 128 (256-friendly for MXU-wide N tiles), rows to 8 ----
    n_pad = _round_up(n, 128)
    if n_pad > 128 and n_pad % 256:
        n_pad = _round_up(n_pad, 256)
    n_rows_pad = _round_up(n, 8)
    # Zero W rows => identity reflections; zero lanes keep padded columns untouched.
    w_pad = jnp.pad(w, ((0, n_rows_pad - n), (0, n_pad - n)))

    B_pad = _round_up(B, 8)                            # batch padded to 8 rows only
    x_pad = jnp.pad(x, ((0, B_pad - B), (0, n_pad - n)))
    b_pad = jnp.pad(bias.astype(jnp.float32), ((0, 0), (0, n_pad - n)))

    w_bytes = 2 * n_rows_pad * n_pad * 4               # double-buffered resident W
    # TODO(synk): for very large n (resident W overflowing VMEM, esp. v7x's 64 MiB),
    #             stream W row-blocks with manual DMA instead of keeping it resident.

    # =========================================================================
    # Small-batch / inference path: O(B*n^2), no Q materialization, stays in f32.
    # =========================================================================
    if B_pad < n_pad:
        tile_b = min(256, B_pad)
        if B_pad >= 16 and pl.cdiv(B_pad, tile_b) < 2:
            tile_b = _round_up(pl.cdiv(B_pad, 2), 8)   # >=2 blocks for v7x's 2 TCs
        grid_b = pl.cdiv(B_pad, tile_b)
        footprint = (w_bytes
                     + 2 * tile_b * n_pad * 4
                     + 2 * tile_b * n_pad * x.dtype.itemsize
                     + 2 * n_pad * 4)
        out = pl.pallas_call(
            apply_chain_kernel,
            out_shape=jax.ShapeDtypeStruct((B_pad, n_pad), x.dtype),
            grid_spec=pltpu.PrefetchScalarGridSpec(
                num_scalar_prefetch=0,
                grid=(grid_b,),
                in_specs=[
                    pl.BlockSpec((n_rows_pad, n_pad), lambda i: (0, 0)),  # W resident
                    pl.BlockSpec((tile_b, n_pad), lambda i: (i, 0)),
                    pl.BlockSpec((1, n_pad), lambda i: (0, 0)),
                ],
                out_specs=pl.BlockSpec((tile_b, n_pad), lambda i: (i, 0)),
            ),
            compiler_params=pltpu.CompilerParams(
                dimension_semantics=("parallel",),
                vmem_limit_bytes=_vmem_limit(footprint),
            ),
        )(w_pad, x_pad, b_pad)
        return out[:B, :n]

    # =========================================================================
    # Large-batch path: build Q once (amortized O(n^3)), then bf16 MXU matmul.
    # =========================================================================
    q_tile = _row_tile(n_pad, 256)
    if n_pad // q_tile < 2:
        q_tile = _row_tile(n_pad, n_pad // 2)          # >=2 blocks for v7x's 2 TCs
    esz = jnp.dtype(matmul_dtype).itemsize
    q_footprint = w_bytes + 2 * q_tile * n_pad * esz
    q = pl.pallas_call(
        build_q_kernel,
        out_shape=jax.ShapeDtypeStruct((n_pad, n_pad), matmul_dtype),
        grid_spec=pltpu.PrefetchScalarGridSpec(
            num_scalar_prefetch=0,
            grid=(n_pad // q_tile,),
            in_specs=[pl.BlockSpec((n_rows_pad, n_pad), lambda r: (0, 0))],
            out_specs=pl.BlockSpec((q_tile, n_pad), lambda r: (r, 0)),
        ),
        compiler_params=pltpu.CompilerParams(
            dimension_semantics=("parallel",),
            vmem_limit_bytes=_vmem_limit(q_footprint),
        ),
    )(w_pad)
    # TODO(synk): for n in the thousands, build Q with a blocked compact-WY (MXU)
    #             formulation instead of this sequential VPU/XLU reflection chain.

    xm = x_pad.astype(matmul_dtype)                    # bf16 feeds, f32 accumulation

    tm = min(max_batch_tile, B_pad)
    tn = n_pad if n_pad <= 2048 else _lane_tile(n_pad, 512)
    if pl.cdiv(B_pad, tm) * (n_pad // tn) < 2:
        tm = _round_up(pl.cdiv(B_pad, 2), 8)           # >=2 blocks for v7x's 2 TCs
    grid_m = pl.cdiv(B_pad, tm)
    grid_n = n_pad // tn

    fullk_footprint = (2 * tm * n_pad * esz + 2 * n_pad * tn * esz
                       + 2 * tm * tn * x.dtype.itemsize + 2 * tn * 4)
    if fullk_footprint <= (28 << 20):
        # Single-shot K: no accumulator RMW, no per-K grid-step overhead.
        out = pl.pallas_call(
            matmul_bias_fullk_kernel,
            out_shape=jax.ShapeDtypeStruct((B_pad, n_pad), x.dtype),
            grid_spec=pltpu.PrefetchScalarGridSpec(
                num_scalar_prefetch=0,
                grid=(grid_m, grid_n),
                in_specs=[
                    pl.BlockSpec((tm, n_pad), lambda i, j: (i, 0)),
                    pl.BlockSpec((n_pad, tn), lambda i, j: (0, j)),
                    pl.BlockSpec((1, tn), lambda i, j: (0, j)),
                ],
                out_specs=pl.BlockSpec((tm, tn), lambda i, j: (i, j)),
            ),
            compiler_params=pltpu.CompilerParams(
                dimension_semantics=("parallel", "parallel"),
                vmem_limit_bytes=_vmem_limit(fullk_footprint),
            ),
        )(xm, q, b_pad)
    else:
        tk = _lane_tile(n_pad, 512)
        grid_k = n_pad // tk
        footprint = (2 * tm * tk * esz + 2 * tk * tn * esz + tm * tn * 4
                     + 2 * tm * tn * x.dtype.itemsize + 2 * tn * 4)
        out = pl.pallas_call(
            matmul_bias_tiledk_kernel,
            out_shape=jax.ShapeDtypeStruct((B_pad, n_pad), x.dtype),
            grid_spec=pltpu.PrefetchScalarGridSpec(
                num_scalar_prefetch=0,
                grid=(grid_m, grid_n, grid_k),         # K axis last
                in_specs=[
                    pl.BlockSpec((tm, tk), lambda i, j, k: (i, k)),
                    pl.BlockSpec((tk, tn), lambda i, j, k: (k, j)),
                    pl.BlockSpec((1, tn), lambda i, j, k: (0, j)),
                ],
                out_specs=pl.BlockSpec((tm, tn), lambda i, j, k: (i, j)),
                scratch_shapes=[pltpu.VMEM((tm, tn), jnp.float32)],
            ),
            compiler_params=pltpu.CompilerParams(
                dimension_semantics=("parallel", "parallel", "arbitrary"),
                vmem_limit_bytes=_vmem_limit(footprint),
            ),
        )(xm, q, b_pad)

    return out[:B, :n]


# ----------------------------------------------------------------------------
# Pure-JAX reference mirroring the PyTorch Hprod loop exactly.
# ----------------------------------------------------------------------------
def orthogonal_linear_ref(x, U, bias):
    n = x.shape[1]
    for i in range(n):
        k = n - i
        u = U[i]
        alpha = 2.0 * (x[:, -k:] @ u[-k:]) / jnp.sum(u[-k:] * u[-k:])
        x = jnp.concatenate(
            [x[:, : n - k], x[:, -k:] - alpha[:, None] * u[-k:][None, :]], axis=1
        )
    return x + bias


if __name__ == "__main__":
    insize = outsize = 32   # SquareLinear: insize == outsize
    use_bias = True

    key = jax.random.PRNGKey(0)
    kx, ku, kb, kx2 = jax.random.split(key, 4)

    # Deterministic parameter init matching the module's __init__:
    #   U = triu(randn(insize, insize))
    U = jnp.triu(jax.random.normal(ku, (insize, insize), dtype=jnp.float32))
    #   bias: zeros(1, outsize) or uniform(-1/sqrt(insize), 1/sqrt(insize)) if bias=True
    if use_bias:
        bound = 1.0 / math.sqrt(insize)
        bias = jax.random.uniform(
            kb, (1, outsize), dtype=jnp.float32, minval=-bound, maxval=bound
        )
    else:
        bias = jnp.zeros((1, outsize), dtype=jnp.float32)

    # --- small batch: exercises the direct reflection-chain path (f32) ---
    x_small = jax.random.normal(kx, (16, insize), dtype=jnp.float32)
    out_small = jax.block_until_ready(orthogonal_linear(x_small, U, bias))
    ref_small = orthogonal_linear_ref(x_small, U, bias)
    assert out_small.shape == (16, outsize)
    assert jnp.allclose(out_small, ref_small, atol=1e-4, rtol=1e-4), \
        "small-batch path mismatch vs reference"

    # --- larger batch: exercises the Q build + bf16 MXU matmul path ---
    x_big = jax.random.normal(kx2, (256, insize), dtype=jnp.float32)
    out_big = jax.block_until_ready(orthogonal_linear(x_big, U, bias))
    ref_big = orthogonal_linear_ref(x_big, U, bias)
    assert out_big.shape == (256, outsize)
    assert jnp.allclose(out_big, ref_big, atol=5e-2, rtol=5e-2), \
        "large-batch (bf16 matmul) path mismatch vs reference"

    # Sanity: the effective map is orthogonal, so norms are preserved (bias removed).
    assert jnp.allclose(
        jnp.linalg.norm(out_small - bias, axis=1),
        jnp.linalg.norm(x_small, axis=1), atol=1e-3,
    )

    print("KERNEL_OK")
</pallas_src>

<mosaic_0001>
module attributes {stable_mosaic.version = 11 : i64} {
  func.func @apply_chain_kernel(%arg0: i32, %arg1: memref<32x128xf32, #tpu.memory_space<vmem>>, %arg2: memref<8x128xf32, #tpu.memory_space<vmem>>, %arg3: memref<1x128xf32, #tpu.memory_space<vmem>>, %arg4: memref<8x128xf32, #tpu.memory_space<vmem>>) attributes {dimension_semantics = [#tpu.dimension_semantics<parallel>], iteration_bounds = array<i64: 2>, scalar_prefetch = 0 : i64, scratch_operands = 0 : i64, tpu.core_type = #tpu.core_type<tc>, window_params = [{pipeline_mode = #tpu.pipeline_mode<synchronous>, transform_indices = @transform_0, window_bounds = array<i64: 32, 128>}, {transform_indices = @transform_1, window_bounds = array<i64: 8, 128>}, {pipeline_mode = #tpu.pipeline_mode<synchronous>, transform_indices = @transform_2, window_bounds = array<i64: 1, 128>}, {transform_indices = @transform_3, window_bounds = array<i64: 8, 128>}]} {
    %c0 = arith.constant 0 : index
    %c0_0 = arith.constant 0 : index
    %0 = vector.load %arg2[%c0, %c0_0] : memref<8x128xf32, #tpu.memory_space<vmem>>, vector<8x128xf32>
    %c0_i32 = arith.constant 0 : i32
    %c4_i32 = arith.constant 4 : i32
    %1 = arith.addi %c0_i32, %c4_i32 : i32
    %c1_i32 = arith.constant 1 : i32
    %2 = scf.for %arg5 = %c0_i32 to %1 step %c1_i32 iter_args(%arg6 = %0) -> (vector<8x128xf32>)  : i32 {
      %c8_i32 = arith.constant 8 : i32
      %7 = arith.muli %arg5, %c8_i32 : i32
      %8 = tpu.assume_multiple %7, 8 : i32
      %9 = arith.index_cast %8 : i32 to index
      %c0_6 = arith.constant 0 : index
      %10 = vector.load %arg1[%9, %c0_6] : memref<32x128xf32, #tpu.memory_space<vmem>>, vector<8x128xf32>
      %11 = vector.extract_strided_slice %10 {offsets = [0, 0], sizes = [1, 128], strides = [1, 1]} : vector<8x128xf32> to vector<1x128xf32>
      %12 = vector.broadcast %11 : vector<1x128xf32> to vector<8x128xf32>
      %13 = arith.mulf %arg6, %12 : vector<8x128xf32>
      %cst = arith.constant dense<0.000000e+00> : vector<8xf32>
      %14 = vector.multi_reduction <add>, %13, %cst [1] : vector<8x128xf32> to vector<8xf32>
      %15 = vector.shape_cast %14 : vector<8xf32> to vector<8x1xf32>
      %16 = vector.broadcast %15 : vector<8x1xf32> to vector<8x128xf32>
      %17 = vector.broadcast %11 : vector<1x128xf32> to vector<8x128xf32>
      %18 = arith.mulf %16, %17 : vector<8x128xf32>
      %19 = arith.subf %arg6, %18 : vector<8x128xf32>
      %20 = vector.extract_strided_slice %10 {offsets = [1, 0], sizes = [1, 128], strides = [1, 1]} : vector<8x128xf32> to vector<1x128xf32>
      %21 = vector.broadcast %20 : vector<1x128xf32> to vector<8x128xf32>
      %22 = arith.mulf %19, %21 : vector<8x128xf32>
      %cst_7 = arith.constant dense<0.000000e+00> : vector<8xf32>
      %23 = vector.multi_reduction <add>, %22, %cst_7 [1] : vector<8x128xf32> to vector<8xf32>
      %24 = vector.shape_cast %23 : vector<8xf32> to vector<8x1xf32>
      %25 = vector.broadcast %24 : vector<8x1xf32> to vector<8x128xf32>
      %26 = vector.broadcast %20 : vector<1x128xf32> to vector<8x128xf32>
      %27 = arith.mulf %25, %26 : vector<8x128xf32>
      %28 = arith.subf %19, %27 : vector<8x128xf32>
      %29 = vector.extract_strided_slice %10 {offsets = [2, 0], sizes = [1, 128], strides = [1, 1]} : vector<8x128xf32> to vector<1x128xf32>
      %30 = vector.broadcast %29 : vector<1x128xf32> to vector<8x128xf32>
      %31 = arith.mulf %28, %30 : vector<8x128xf32>
      %cst_8 = arith.constant dense<0.000000e+00> : vector<8xf32>
      %32 = vector.multi_reduction <add>, %31, %cst_8 [1] : vector<8x128xf32> to vector<8xf32>
      %33 = vector.shape_cast %32 : vector<8xf32> to vector<8x1xf32>
      %34 = vector.broadcast %33 : vector<8x1xf32> to vector<8x128xf32>
      %35 = vector.broadcast %29 : vector<1x128xf32> to vector<8x128xf32>
      %36 = arith.mulf %34, %35 : vector<8x128xf32>
      %37 = arith.subf %28, %36 : vector<8x128xf32>
      %38 = vector.extract_strided_slice %10 {offsets = [3, 0], sizes = [1, 128], strides = [1, 1]} : vector<8x128xf32> to vector<1x128xf32>
      %39 = vector.broadcast %38 : vector<1x128xf32> to vector<8x128xf32>
      %40 = arith.mulf %37, %39 : vector<8x128xf32>
      %cst_9 = arith.constant dense<0.000000e+00> : vector<8xf32>
      %41 = vector.multi_reduction <add>, %40, %cst_9 [1] : vector<8x128xf32> to vector<8xf32>
      %42 = vector.shape_cast %41 : vector<8xf32> to vector<8x1xf32>
      %43 = vector.broadcast %42 : vector<8x1xf32> to vector<8x128xf32>
      %44 = vector.broadcast %38 : vector<1x128xf32> to vector<8x128xf32>
      %45 = arith.mulf %43, %44 : vector<8x128xf32>
      %46 = arith.subf %37, %45 : vector<8x128xf32>
      %47 = vector.extract_strided_slice %10 {offsets = [4, 0], sizes = [1, 128], strides = [1, 1]} : vector<8x128xf32> to vector<1x128xf32>
      %48 = vector.broadcast %47 : vector<1x128xf32> to vector<8x128xf32>
      %49 = arith.mulf %46, %48 : vector<8x128xf32>
      %cst_10 = arith.constant dense<0.000000e+00> : vector<8xf32>
      %50 = vector.multi_reduction <add>, %49, %cst_10 [1] : vector<8x128xf32> to vector<8xf32>
      %51 = vector.shape_cast %50 : vector<8xf32> to vector<8x1xf32>
      %52 = vector.broadcast %51 : vector<8x1xf32> to vector<8x128xf32>
      %53 = vector.broadcast %47 : vector<1x128xf32> to vector<8x128xf32>
      %54 = arith.mulf %52, %53 : vector<8x128xf32>
      %55 = arith.subf %46, %54 : vector<8x128xf32>
      %56 = vector.extract_strided_slice %10 {offsets = [5, 0], sizes = [1, 128], strides = [1, 1]} : vector<8x128xf32> to vector<1x128xf32>
      %57 = vector.broadcast %56 : vector<1x128xf32> to vector<8x128xf32>
      %58 = arith.mulf %55, %57 : vector<8x128xf32>
      %cst_11 = arith.constant dense<0.000000e+00> : vector<8xf32>
      %59 = vector.multi_reduction <add>, %58, %cst_11 [1] : vector<8x128xf32> to vector<8xf32>
      %60 = vector.shape_cast %59 : vector<8xf32> to vector<8x1xf32>
      %61 = vector.broadcast %60 : vector<8x1xf32> to vector<8x128xf32>
      %62 = vector.broadcast %56 : vector<1x128xf32> to vector<8x128xf32>
      %63 = arith.mulf %61, %62 : vector<8x128xf32>
      %64 = arith.subf %55, %63 : vector<8x128xf32>
      %65 = vector.extract_strided_slice %10 {offsets = [6, 0], sizes = [1, 128], strides = [1, 1]} : vector<8x128xf32> to vector<1x128xf32>
      %66 = vector.broadcast %65 : vector<1x128xf32> to vector<8x128xf32>
      %67 = arith.mulf %64, %66 : vector<8x128xf32>
      %cst_12 = arith.constant dense<0.000000e+00> : vector<8xf32>
      %68 = vector.multi_reduction <add>, %67, %cst_12 [1] : vector<8x128xf32> to vector<8xf32>
      %69 = vector.shape_cast %68 : vector<8xf32> to vector<8x1xf32>
      %70 = vector.broadcast %69 : vector<8x1xf32> to vector<8x128xf32>
      %71 = vector.broadcast %65 : vector<1x128xf32> to vector<8x128xf32>
      %72 = arith.mulf %70, %71 : vector<8x128xf32>
      %73 = arith.subf %64, %72 : vector<8x128xf32>
      %74 = vector.extract_strided_slice %10 {offsets = [7, 0], sizes = [1, 128], strides = [1, 1]} : vector<8x128xf32> to vector<1x128xf32>
      %75 = vector.broadcast %74 : vector<1x128xf32> to vector<8x128xf32>
      %76 = arith.mulf %73, %75 : vector<8x128xf32>
      %cst_13 = arith.constant dense<0.000000e+00> : vector<8xf32>
      %77 = vector.multi_reduction <add>, %76, %cst_13 [1] : vector<8x128xf32> to vector<8xf32>
      %78 = vector.shape_cast %77 : vector<8xf32> to vector<8x1xf32>
      %79 = vector.broadcast %78 : vector<8x1xf32> to vector<8x128xf32>
      %80 = vector.broadcast %74 : vector<1x128xf32> to vector<8x128xf32>
      %81 = arith.mulf %79, %80 : vector<8x128xf32>
      %82 = arith.subf %73, %81 : vector<8x128xf32>
      scf.yield %82 : vector<8x128xf32>
    }
    %c4_i32_1 = arith.constant 4 : i32
    %c0_2 = arith.constant 0 : index
    %c0_3 = arith.constant 0 : index
    %3 = vector.load %arg3[%c0_2, %c0_3] : memref<1x128xf32, #tpu.memory_space<vmem>>, vector<1x128xf32>
    %4 = vector.broadcast %3 : vector<1x128xf32> to vector<8x128xf32>
    %5 = arith.addf %2, %4 : vector<8x128xf32>
    %c0_4 = arith.constant 0 : index
    %c0_5 = arith.constant 0 : index
    %6 = vector.load %arg4[%c0_4, %c0_5] : memref<8x128xf32, #tpu.memory_space<vmem>>, vector<8x128xf32>
    tpu.vector_store %arg4[%c0_4, %c0_5], %5 {strides = array<i32>} : memref<8x128xf32, #tpu.memory_space<vmem>>, vector<8x128xf32>,
    return
  }
  func.func @transform_0(%arg0: i32) -> (i32, i32) {
    %c0_i32 = arith.constant 0 : i32
    %c0_i32_0 = arith.constant 0 : i32
    %c0_i32_1 = arith.constant 0 : i32
    return %c0_i32, %c0_i32_0 : i32, i32
  }
  func.func @transform_1(%arg0: i32) -> (i32, i32) {
    %c0_i32 = arith.constant 0 : i32
    %c0_i32_0 = arith.constant 0 : i32
    return %arg0, %c0_i32 : i32, i32
  }
  func.func @transform_2(%arg0: i32) -> (i32, i32) {
    %c0_i32 = arith.constant 0 : i32
    %c0_i32_0 = arith.constant 0 : i32
    %c0_i32_1 = arith.constant 0 : i32
    return %c0_i32, %c0_i32_0 : i32, i32
  }
  func.func @transform_3(%arg0: i32) -> (i32, i32) {
    %c0_i32 = arith.constant 0 : i32
    %c0_i32_0 = arith.constant 0 : i32
    return %arg0, %c0_i32 : i32, i32
  }
}

</mosaic_0001>

<bundles_post_ra>
// kernel: tpu_custom_call.1
= control target key start
LH: loop header
LB: loop body
LE: loop exit
PB: predicated region body
PF: predicated region fallthrough
CT: control target
= control target key end

     0   :  { %8 = vsyncpa [#allocation3], 0  ;;  %s792_s0 = inlined_call_operand.hbm [shape: f32[32,128], index: 0, kind: input, shape index: {}]   ;;  %s793_s1 = inlined_call_operand.hbm [shape: f32[16,128], index: 1, kind: input, shape index: {}]   ;;  %s794_s2 = inlined_call_operand.vmem [shape: f32[1,128], index: 2, kind: input, shape index: {}]   ;;  %s795_s3 = inlined_call_operand.hbm [shape: f32[16,128], index: 3, kind: output, shape index: {}]  }
   0x1   :  { %9 = vsyncpa [#allocation6], 0 }
   0x2   :  { %11 = vsyncpa [#allocation6 + $0x1], 0 }
   0x3   :  { %12 = vsyncpa [#allocation4], 0 }
   0x4   :  { %14 = vsyncpa [#allocation4 + $0x1], 0  ;;  %s640_s12 = smov 0   ;;  %s642_s13 = smov 0  }
   0x5   :  { %s644_s14 = smov 0   ;;  %s646_s15 = smov 0  }
   0x6 LB: > { %s130_s18 = sshll.u32 %s792_s0, 4  ;;  %s664_s19 = sadd.s32 4294967295, %s607_s15   ;;  %s607_s15 = sphi %s646_s15, %s805_s15   ;;  %s603_s14 = sphi %s644_s14, %s804_s14   ;;  %s599_s13 = sphi %s642_s13, %s803_s13   ;;  %s595_s12 = sphi %s640_s12, %s802_s12   ;;  %s131_s18 = int_to_ptr.hbm [resolvable:$true] %s130_s18 }
   0x7   : > { %p379_p0 = scmp.ge.s32.totalorder %s607_s15, 1  ;;  %p62_p1 = scmp.eq.s32.totalorder %s664_s19, 0 }
   0x8   : > { %p119_p2 = scmp.lt.s32.totalorder %s607_s15, 3  ;;  %s617_s21 = smov [#allocation2]  }
   0x9   : > { %s132_s22 = sshll.u32 %s617_s21, 4  ;;  %s618_s23 = smov 128   ;;  %s133_s22 = int_to_ptr.vmem [resolvable:$true] %s132_s22 }
   0xa   : > { %p669_p3 = pnand %p379_p0, %p119_p2  ;;  %s619_s24 = smov 8  }
   0xb   : > { %s378_s25 = sadd.s32 4294967294, %s607_s15   ;;  %s680_s26 = sadd.s32 1, %s607_s15  }
   0xc   : > { %p401_p4 = pneg %p669_p3  ;;  %s48_s27 = sadd.s32 1, %s603_s14 }
   0xd   : > { %s45_s28 = ssub.s32 %s607_s15, %s680_s26  ;;  %p55_p7 = scmp.ne.s32.totalorder %s603_s14, %s599_s13 }
   0xe   : > { %p402_p6 = pnand %p401_p4, %p62_p1  ;;  %p46_p8 = scmp.eq.s32.totalorder %s45_s28, 0 }
   0xf   : > { %p56_p9 = scmp.eq.s32.totalorder %s607_s15, 0  ;;  %p61_p10 = scmp.ne.s32.totalorder %s599_s13, %s595_s12 }
  0x10   : > { %404 = dma.hbm_to_vmem [thread:$0]  (!%p402_p6), %s131_s18, 512, %s133_s22, [#allocation3], %s618_s23, %s618_s23, %s619_s24  }
  0x11   : > { %p106_p11 = scmp.eq.s32.totalorder %s664_s19, 1  ;;  %p696_p12 = por %p62_p1, %p61_p10 }
  0x12   : > { %s692_s29 = scalar_select %p46_p8, %s603_s14, %s48_s27  }
  0x13   : > { %p700_p13 = por %p106_p11, %p55_p7  ;;  %p112_p0 = scmp.eq.s32.totalorder %s378_s25, 1 }
  0x14   : > { %p57_p2 = por %p56_p9, %p55_p7  ;;  %s149_s5 = sand.u32 1, %s603_s14  }
  0x15   : > { %p705_p4 = por %p112_p0, %p61_p10  ;;  %p414_p6 = scmp.lt.s32.totalorder %s607_s15, 2 }
  0x16   : > { %s382_s7 = sshll.u32 %s149_s5, 3  ;;  %s383_s8 = sshll.u32 %s607_s15, 3 }
  0x17   : > { %s157_s11 = scalar_lea.hbm %s793_s1, %s383_s8  ;;  %s153_s17 = scalar_lea.vmem [#allocation5], %s382_s7 }
  0x18   : > { %s159_s16 = sshll.u32 %s157_s11, 4  ;;  %s161_s18 = sshll.u32 %s153_s17, 4  ;;  %s160_s16 = int_to_ptr.hbm [resolvable:$true] %s159_s16  ;;  %s162_s18 = int_to_ptr.vmem [resolvable:$true] %s161_s18 }
  0x19   : > { %p714_p8 = pnand %p414_p6, %p57_p2  ;;  %s150_s22 = scalar_lea.sflag [#allocation6], %s149_s5 }
  0x1a   : > { %s499_s23 = sshra.s32 %s160_s16, 4  ;;  %s506_s28 = scalar_lea.hbm %s793_s1, 16  ;;  %s500_s23 = int_to_ptr.hbm [resolvable:$true] %s499_s23 }
  0x1b   : > { %s501_s24 = scalar_lea.hbm %s500_s23, 8  ;;  %p503_p9 = pneg %p714_p8 }
  0x1c   : > { %p502_p7 = scmp.ne.s32.totalorder %s500_s23, %s501_s24  ;;  %p507_p0 = scmp.lt.s32.totalorder %s500_s23, %s793_s1 }
  0x1d   : > { %p508_p2 = scmp.lt.s32.totalorder %s506_s28, %s501_s24 }
  0x1e   : > { %p504_p10 = pnand %p503_p9, %p502_p7 }
  0x1f   : > { %p509_p6 = por %p508_p2, %p507_p0 }
  0x20   : > { %p505_p11 = pneg %p504_p10 }
  0x22   : > { %p510_p5 = pnand %p509_p6, %p505_p11 }
  0x24   : > { %513 = shalt.err (!%p510_p5)
}
  0x25   : > { %408 = dma.hbm_to_vmem [thread:$0]  (!%p714_p8), %s160_s16, 128, %s162_s18, %s150_s22  }
  0x26   : > { %170 = sbr.rel (%p669_p3) target bundleno = 1036 (0x40c), region = 32 }
  0x2b   : > { %582 = dma.done.wait (%p62_p1), [#allocation3], 512  }
  0x2c   : > { %584 = vsyncadd (%p62_p1), [#allocation3], 4294966784  ;;  %s735_s5 = sand.u32 1, %s599_s13  }
  0x2d   : > { %s386_s9 = sshll.u32 %s735_s5, 3  ;;  %s178_s10 = scalar_lea.sflag [#allocation6], %s735_s5 }
  0x2e   : > { %s181_s11 = scalar_lea.vmem [#allocation5], %s386_s9 }
  0x2f   : > { %586 = dma.done.wait (%p696_p12), %s178_s10, 128  }
  0x30   : > { %588 = vsyncadd (%p696_p12), %s178_s10, 4294967168  ;;  %v205_v0 = vld [vmem:[%s181_s11] sm:$0xff]   ;;  %s743_s20 = scalar_lea.vmem [#allocation7], %s386_s9  ;;  %s745_s16 = smov 0  }
  0x31   : > { %v609_v1 = vmov %v205_v0  }
  0x32 LB: >> { %s388_s17 = sshll.u32 %s615_s16, 3  ;;  %s211_s16 = sadd.s32 1, %s615_s16   ;;  %s615_s16 = sphi %s745_s16, %s211_s16   ;;  %v611_v1 = vphi %v609_v1, %v610_v1  }
  0x33   : >> { %s214_s18 = scalar_lea.vmem [#allocation2], %s388_s17  ;;  %p208_p1 = scmp.ge.s32.totalorder %s211_s16, 4  }
  0x34   : >> { %v215_v2 = vld [vmem:[%s214_s18] sm:$0xff]  ;;  %s390_s22 = sshll.u32 (%p208_p1), %s664_s19, 3  ;;  %s283_s27 = sshll.u32 (%p208_p1), %s743_s20, 4  ;;  %s284_s27 = int_to_ptr.vmem [resolvable:$true] %s283_s27 }
  0x35   : >> { %v216_v3 = vperm.slane %v215_v2, 0  ;;  %v222_v7 = vperm.slane %v215_v2, 1  ;;  %v228_v12 = vperm.slane %v215_v2, 2  ;;  %v234_v17 = vperm.slane %v215_v2, 3  ;;  %v468_v43 = vld [vmem:[%s794_s2] ss:$0 sm:$0xff] (%p208_p1)  ;;  %s281_s25 = scalar_lea.hbm (%p208_p1), %s795_s3, %s390_s22 }
  0x36   : >> { %v240_v22 = vperm.slane %v215_v2, 4  ;;  %v246_v27 = vperm.slane %v215_v2, 5  ;;  %v252_v32 = vperm.slane %v215_v2, 6  ;;  %v258_v37 = vperm.slane %v215_v2, 7  ;;  %s285_s28 = sshll.u32 (%p208_p1), %s281_s25, 4  ;;  %s271_s7 = scalar_lea.sflag (%p208_p1), [#allocation4], %s735_s5  ;;  %s286_s28 = int_to_ptr.hbm [resolvable:$true] %s285_s28 }
  0x37   : >> { %v217_v4 = vmul.f32 %v611_v1, %v216_v3  ;;  %s543_s8 = sshra.s32 (%p208_p1), %s286_s28, 4  ;;  %s549_s11 = scalar_lea.hbm (%p208_p1), %s795_s3, 16  ;;  %s544_s8 = int_to_ptr.hbm [resolvable:$true] %s543_s8 }
  0x38   : > { %s545_s9 = scalar_lea.hbm (%p208_p1), %s544_s8, 8  ;;  %p550_p8 = scmp.lt.s32.totalorder (%p208_p1), %s544_s8, %s795_s3 }
  0x39   : >> { %218 = vadd.xlane.f32.xlu0 %v217_v4  ;;  %p546_p3 = scmp.ne.s32.totalorder (%p208_p1), %s544_s8, %s545_s9  ;;  %p551_p7 = scmp.lt.s32.totalorder (%p208_p1), %s549_s11, %s545_s9 }
  0x3b   : > { %p547_p5 = pnand (%p208_p1), %p546_p3, %p700_p13  ;;  %p552_p9 = por (%p208_p1), %p551_p7, %p550_p8 }
  0x3d   : > { %p548_p12 = pneg (%p208_p1), %p547_p5 }
  0x3f   : > { %p553_p10 = pnand (%p208_p1), %p552_p9, %p548_p12 }
  0xac   : >> { %v219_v5 = vpop.xlane.xlu0 %218 }
  0xad   : >> { %v220_v6 = vmul.f32 %v219_v5, %v216_v3 }
  0xaf   : >> { %v221_v8 = vsub.f32 %v611_v1, %v220_v6 }
  0xb1   : >> { %v223_v9 = vmul.f32 %v222_v7, %v221_v8 }
  0xb3   : >> { %224 = vadd.xlane.f32.xlu0 %v223_v9 }
 0x126   : >> { %v225_v10 = vpop.xlane.xlu0 %224 }
 0x127   : >> { %v226_v11 = vmul.f32 %v225_v10, %v222_v7 }
 0x129   : >> { %v227_v13 = vsub.f32 %v221_v8, %v226_v11 }
 0x12b   : >> { %v229_v14 = vmul.f32 %v228_v12, %v227_v13 }
 0x12d   : >> { %230 = vadd.xlane.f32.xlu1 %v229_v14 }
 0x1a0   : >> { %v231_v15 = vpop.xlane.xlu1 %230 }
 0x1a1   : >> { %v232_v16 = vmul.f32 %v231_v15, %v228_v12 }
 0x1a3   : >> { %v233_v18 = vsub.f32 %v227_v13, %v232_v16 }
 0x1a5   : >> { %v235_v19 = vmul.f32 %v234_v17, %v233_v18 }
 0x1a7   : >> { %236 = vadd.xlane.f32.xlu1 %v235_v19 }
 0x21a   : >> { %v237_v20 = vpop.xlane.xlu1 %236 }
 0x21b   : >> { %v238_v21 = vmul.f32 %v237_v20, %v234_v17 }
 0x21d   : >> { %v239_v23 = vsub.f32 %v233_v18, %v238_v21 }
 0x21f   : >> { %v241_v24 = vmul.f32 %v240_v22, %v239_v23 }
 0x221   : >> { %242 = vadd.xlane.f32.xlu2 %v241_v24 }
 0x294   : >> { %v243_v25 = vpop.xlane.xlu2 %242 }
 0x295   : >> { %v244_v26 = vmul.f32 %v243_v25, %v240_v22 }
 0x297   : >> { %v245_v28 = vsub.f32 %v239_v23, %v244_v26 }
 0x299   : >> { %v247_v29 = vmul.f32 %v246_v27, %v245_v28 }
 0x29b   : >> { %248 = vadd.xlane.f32.xlu2 %v247_v29 }
 0x30e   : >> { %v249_v30 = vpop.xlane.xlu2 %248 }
 0x30f   : >> { %v250_v31 = vmul.f32 %v249_v30, %v246_v27 }
 0x311   : >> { %v251_v33 = vsub.f32 %v245_v28, %v250_v31 }
 0x313   : >> { %v253_v34 = vmul.f32 %v252_v32, %v251_v33 }
 0x315   : >> { %254 = vadd.xlane.f32.xlu0 %v253_v34 }
 0x388   : >> { %v255_v35 = vpop.xlane.xlu0 %254 }
 0x389   : >> { %v256_v36 = vmul.f32 %v255_v35, %v252_v32 }
 0x38b   : >> { %v257_v38 = vsub.f32 %v251_v33, %v256_v36 }
 0x38d   : >> { %v259_v39 = vmul.f32 %v258_v37, %v257_v38 }
 0x38f   : >> { %260 = vadd.xlane.f32.xlu1 %v259_v39 }
 0x402   : >> { %v261_v40 = vpop.xlane.xlu1 %260 }
 0x403   : >> { %v262_v41 = vmul.f32 %v261_v40, %v258_v37  ;;  %210 = sbr.rel (!%p208_p1) target bundleno = 50 (0x32), region = 90 }
 0x405   : >> { %v263_v42 = vsub.f32 %v257_v38, %v262_v41  }
 0x407   : >> { %v610_v1 = vmov %v263_v42   ;;  %v268_v44 = vadd.f32 (%p208_p1), %v468_v43, %v263_v42 }
 0x409   : > { %269 = vst [vmem:[%s743_s20] sm:$0xff] %v268_v44 }
 0x40a   : > { %556 = shalt.err (!%p553_p10)
}
 0x40b   : > { %399 = dma.vmem_to_hbm [thread:$0]  (%p700_p13), %s284_s27, 128, %s286_s28, %s271_s7  }
 0x40c PF: > { %s297_s5 = sand.u32 1, %s595_s12   ;;  %p801_p11 = scmp.ge.s32.totalorder %s607_s15, 2 }
 0x40d   : > { %s298_s20 = scalar_lea.sflag [#allocation4], %s297_s5 }
 0x40e   : > { %p410_p0 = pnand %p801_p11, %p705_p4 }
 0x410   : > { %p411_p2 = pneg %p410_p0 }
 0x412   : > { %590 = dma.done.wait (%p411_p2), %s298_s20, 128  }
 0x413   : > { %592 = vsyncadd (%p411_p2), %s298_s20, 4294967168  ;;  %p17_p6 = scmp.ge.s32.totalorder %s680_s26, 4   ;;  %s802_s12 = smov %s599_s13 }
 0x414   : > { %s803_s13 = smov %s603_s14  ;;  %s804_s14 = smov %s692_s29 }
 0x415   : > { %s805_s15 = smov %s680_s26  ;;  %19 = sbr.rel (!%p17_p6) target bundleno = 6 (0x6), region = 101 }
 0x41a   :  { %304 = vsyncpa [#allocation3], 1 }
 0x41b   :  { %306 = vsyncpa [#allocation3 + $0x1], 1 }
 0x41c   :  { %307 = vsyncpa [#allocation6], 1 }
 0x41d   :  { %309 = vsyncpa [#allocation6 + $0x1], 1 }
 0x41e   :  { %310 = vsyncpa [#allocation4], 1 }
 0x41f   :  { %312 = vsyncpa [#allocation4 + $0x1], 1 }

</bundles_post_ra>
